<compile_context>
chip_gen: v7x
topology: tpu7x:2x2x1
jax: 0.10.0
libtpu: 0.0.40
codegen_flags: <defaults>
</compile_context>

<pallas_src>
import jax
import jax.numpy as jnp
from jax.experimental import pallas as pl
from jax.experimental.pallas import tpu as pltpu

_PACK = 16                  # samples packed per 128-lane row
_IN = 8                     # input features
_HID = 16                   # hidden features
_OUT = 8                    # output features
_LANE_IN = _PACK * _IN      # 128
_LANE_HID = _PACK * _HID    # 256
_LANE_OUT = _PACK * _OUT    # 128


def _round_up(a, m):
    return ((a + m - 1) // m) * m


def _mlp_kernel(x_ref, w1_ref, b1_ref, w2_ref, b2_ref, w3_ref, b3_ref, o_ref):
    # x_ref: (TR, 128) tile = 16 samples x 8 features per row.  Weights are
    # block-diagonal, so one dense (TR,128)@(128,256) dot applies linear1 to all
    # 16 packed samples at once; likewise for layers 2 and 3.
    h = jnp.dot(x_ref[...], w1_ref[...], preferred_element_type=jnp.float32)    # (TR, 256) f32
    h = jnp.maximum(h + b1_ref[...], 0.0)                                        # bias + ReLU, f32
    h = jnp.dot(h.astype(w2_ref.dtype), w2_ref[...],
                preferred_element_type=jnp.float32)                              # (TR, 256) f32
    h = jnp.maximum(h + b2_ref[...], 0.0)
    y = jnp.dot(h.astype(w3_ref.dtype), w3_ref[...],
                preferred_element_type=jnp.float32)                              # (TR, 128) f32
    o_ref[...] = (y + b3_ref[...]).astype(o_ref.dtype)


def nonlocal_fcnn_forward(x, params, *, tile_b=16384, use_bf16=False):
    """Forward pass matching NonLocal_FCNN: relu(L1) -> relu(L2) -> L3.

    x:        (B, 8) activations.
    params:   PyTorch-layout dict: w1 (16,8), b1 (16,), w2 (16,16), b2 (16,),
              w3 (8,16), b3 (8,).
    tile_b:   samples per grid step (internally rounded to a multiple of 128).
    use_bf16: ship activations (input and output) as bf16; accumulation stays f32.
    """
    B, d_in = x.shape
    assert d_in == _IN
    comp_dtype = jnp.bfloat16 if use_bf16 else jnp.float32
    out_dtype = jnp.bfloat16 if use_bf16 else x.dtype

    # ---- row tiling: 16 samples per 128-lane row --------------------------------
    rows = _round_up(B, _PACK) // _PACK
    tr = max(8, min(int(tile_b) // _PACK, _round_up(rows, 8)))
    tr = _round_up(tr, 8)                                  # sublane-aligned row tile
    # Keep >= 2 grid steps when there is enough work so v7x can use both TCs.
    if rows > 8 and _round_up(rows, tr) // tr < 2:
        tr = _round_up((rows + 1) // 2, 8)
    rows_p = _round_up(rows, tr)                           # rows padded to a tile multiple
    bp = rows_p * _PACK
    grid = (rows_p // tr,)

    # ---- pack activations (free reshape; pad only when B is not aligned) --------
    xc = x.astype(comp_dtype)
    if bp != B:
        xc = jnp.pad(xc, ((0, bp - B), (0, 0)))
    xr = xc.reshape(rows_p, _LANE_IN)

    # ---- block-diagonal weights & lane-dense biases (tiny, built once) ----------
    eye = jnp.eye(_PACK, dtype=jnp.float32)
    w1bd = jnp.kron(eye, params["w1"].T.astype(jnp.float32)).astype(comp_dtype)   # (128, 256)
    w2bd = jnp.kron(eye, params["w2"].T.astype(jnp.float32)).astype(comp_dtype)   # (256, 256)
    w3bd = jnp.kron(eye, params["w3"].T.astype(jnp.float32)).astype(comp_dtype)   # (256, 128)
    b1bd = jnp.tile(params["b1"].astype(jnp.float32), _PACK).reshape(1, _LANE_HID)
    b2bd = jnp.tile(params["b2"].astype(jnp.float32), _PACK).reshape(1, _LANE_HID)
    b3bd = jnp.tile(params["b3"].astype(jnp.float32), _PACK).reshape(1, _LANE_OUT)

    yr = pl.pallas_call(
        _mlp_kernel,
        out_shape=jax.ShapeDtypeStruct((rows_p, _LANE_OUT), out_dtype),
        grid_spec=pltpu.PrefetchScalarGridSpec(
            num_scalar_prefetch=0,
            grid=grid,
            in_specs=[
                pl.BlockSpec((tr, _LANE_IN), lambda i: (i, 0)),          # packed x tile
                pl.BlockSpec((_LANE_IN, _LANE_HID), lambda i: (0, 0)),   # w1 block-diag (resident)
                pl.BlockSpec((1, _LANE_HID), lambda i: (0, 0)),          # b1 row
                pl.BlockSpec((_LANE_HID, _LANE_HID), lambda i: (0, 0)),  # w2 block-diag
                pl.BlockSpec((1, _LANE_HID), lambda i: (0, 0)),          # b2 row
                pl.BlockSpec((_LANE_HID, _LANE_OUT), lambda i: (0, 0)),  # w3 block-diag
                pl.BlockSpec((1, _LANE_OUT), lambda i: (0, 0)),          # b3 row
            ],
            out_specs=pl.BlockSpec((tr, _LANE_OUT), lambda i: (i, 0)),   # packed y tile
        ),
        compiler_params=pltpu.CompilerParams(
            dimension_semantics=("parallel",),   # lets v7x shard batch tiles over its 2 TCs
        ),
    )(xr, w1bd, b1bd, w2bd, b2bd, w3bd, b3bd)

    y = yr.reshape(bp, _OUT)
    return y if bp == B else y[:B]


def init_params(key):
    """Deterministic init mimicking torch.nn.Linear's U(-1/sqrt(fan_in), 1/sqrt(fan_in)).

    Weights kept in PyTorch (out_features, in_features) layout.
    """
    ks = jax.random.split(key, 6)

    def linear(kw, kb, fan_in, fan_out):
        bound = 1.0 / jnp.sqrt(float(fan_in))
        w = jax.random.uniform(kw, (fan_out, fan_in), jnp.float32, -bound, bound)
        b = jax.random.uniform(kb, (fan_out,), jnp.float32, -bound, bound)
        return w, b

    w1, b1 = linear(ks[0], ks[1], 8, 16)
    w2, b2 = linear(ks[2], ks[3], 16, 16)
    w3, b3 = linear(ks[4], ks[5], 16, 8)
    return {"w1": w1, "b1": b1, "w2": w2, "b2": b2, "w3": w3, "b3": b3}


def reference_forward(x, p):
    h = jnp.maximum(x @ p["w1"].T + p["b1"], 0.0)
    h = jnp.maximum(h @ p["w2"].T + p["b2"], 0.0)
    return h @ p["w3"].T + p["b3"]


if __name__ == "__main__":
    key = jax.random.PRNGKey(0)
    k_param, k1, k2, k3 = jax.random.split(key, 4)
    params = init_params(k_param)

    # 1) f32 path, aligned batch -> 2 grid steps (exercises the v7x 2-TC split), no pad/slice.
    x1 = jax.random.normal(k1, (512, 8), jnp.float32)
    out1 = jax.block_until_ready(nonlocal_fcnn_forward(x1, params))
    ref1 = reference_forward(x1, params)
    assert out1.shape == (512, 8)
    assert jnp.allclose(out1, ref1, atol=1e-4, rtol=1e-4), "f32 mismatch vs. JAX reference"

    # 2) f32 path, non-aligned batch (exercises the pad + slice path).
    x2 = jax.random.normal(k2, (300, 8), jnp.float32)
    out2 = jax.block_until_ready(nonlocal_fcnn_forward(x2, params))
    ref2 = reference_forward(x2, params)
    assert out2.shape == (300, 8)
    assert jnp.allclose(out2, ref2, atol=1e-4, rtol=1e-4), "f32 (padded) mismatch vs. reference"

    # 3) bf16 transfer path (bf16 in/out, f32 accumulate), small single-tile batch.
    x3 = jax.random.normal(k3, (64, 8), jnp.float32)
    out3 = jax.block_until_ready(nonlocal_fcnn_forward(x3, params, use_bf16=True))
    ref3 = reference_forward(x3, params)
    assert out3.shape == (64, 8)
    err = jnp.max(jnp.abs(out3.astype(jnp.float32) - ref3))
    assert err < 5e-2, f"bf16 mismatch vs. JAX reference (max abs err {err})"

    print("KERNEL_OK")
</pallas_src>

<mosaic_0001>
module attributes {stable_mosaic.version = 11 : i64} {
  func.func @_mlp_kernel(%arg0: i32, %arg1: memref<16x128xf32, #tpu.memory_space<vmem>>, %arg2: memref<128x256xf32, #tpu.memory_space<vmem>>, %arg3: memref<1x256xf32, #tpu.memory_space<vmem>>, %arg4: memref<256x256xf32, #tpu.memory_space<vmem>>, %arg5: memref<1x256xf32, #tpu.memory_space<vmem>>, %arg6: memref<256x128xf32, #tpu.memory_space<vmem>>, %arg7: memref<1x128xf32, #tpu.memory_space<vmem>>, %arg8: memref<16x128xf32, #tpu.memory_space<vmem>>) attributes {dimension_semantics = [#tpu.dimension_semantics<parallel>], iteration_bounds = array<i64: 2>, scalar_prefetch = 0 : i64, scratch_operands = 0 : i64, tpu.core_type = #tpu.core_type<tc>, window_params = [{transform_indices = @transform_0, window_bounds = array<i64: 16, 128>}, {pipeline_mode = #tpu.pipeline_mode<synchronous>, transform_indices = @transform_1, window_bounds = array<i64: 128, 256>}, {pipeline_mode = #tpu.pipeline_mode<synchronous>, transform_indices = @transform_2, window_bounds = array<i64: 1, 256>}, {pipeline_mode = #tpu.pipeline_mode<synchronous>, transform_indices = @transform_3, window_bounds = array<i64: 256, 256>}, {pipeline_mode = #tpu.pipeline_mode<synchronous>, transform_indices = @transform_4, window_bounds = array<i64: 1, 256>}, {pipeline_mode = #tpu.pipeline_mode<synchronous>, transform_indices = @transform_5, window_bounds = array<i64: 256, 128>}, {pipeline_mode = #tpu.pipeline_mode<synchronous>, transform_indices = @transform_6, window_bounds = array<i64: 1, 128>}, {transform_indices = @transform_7, window_bounds = array<i64: 16, 128>}]} {
    %c0 = arith.constant 0 : index
    %c0_0 = arith.constant 0 : index
    %0 = vector.load %arg1[%c0, %c0_0] : memref<16x128xf32, #tpu.memory_space<vmem>>, vector<16x128xf32>
    %c0_1 = arith.constant 0 : index
    %c0_2 = arith.constant 0 : index
    %1 = vector.load %arg2[%c0_1, %c0_2] : memref<128x256xf32, #tpu.memory_space<vmem>>, vector<128x256xf32>
    %cst = arith.constant dense<0.000000e+00> : vector<16x256xf32>
    %2 = tpu.matmul %0, %1, %cst {dimension_numbers = #tpu.dot_dimension_numbers<[1], [0], [0], [1], [0, 0, 1, 1], [], []>} : vector<16x128xf32>, vector<128x256xf32>, vector<16x256xf32> -> vector<16x256xf32>
    %c0_3 = arith.constant 0 : index
    %c0_4 = arith.constant 0 : index
    %3 = vector.load %arg3[%c0_3, %c0_4] : memref<1x256xf32, #tpu.memory_space<vmem>>, vector<1x256xf32>
    %4 = vector.broadcast %3 : vector<1x256xf32> to vector<16x256xf32>
    %5 = arith.addf %2, %4 : vector<16x256xf32>
    %cst_5 = arith.constant 0.000000e+00 : f32
    %6 = vector.broadcast %cst_5 : f32 to vector<16x256xf32>
    %7 = arith.maximumf %5, %6 : vector<16x256xf32>
    %c0_6 = arith.constant 0 : index
    %c0_7 = arith.constant 0 : index
    %8 = vector.load %arg4[%c0_6, %c0_7] : memref<256x256xf32, #tpu.memory_space<vmem>>, vector<256x256xf32>
    %cst_8 = arith.constant dense<0.000000e+00> : vector<16x256xf32>
    %9 = tpu.matmul %7, %8, %cst_8 {dimension_numbers = #tpu.dot_dimension_numbers<[1], [0], [0], [1], [0, 0, 1, 1], [], []>} : vector<16x256xf32>, vector<256x256xf32>, vector<16x256xf32> -> vector<16x256xf32>
    %c0_9 = arith.constant 0 : index
    %c0_10 = arith.constant 0 : index
    %10 = vector.load %arg5[%c0_9, %c0_10] : memref<1x256xf32, #tpu.memory_space<vmem>>, vector<1x256xf32>
    %11 = vector.broadcast %10 : vector<1x256xf32> to vector<16x256xf32>
    %12 = arith.addf %9, %11 : vector<16x256xf32>
    %cst_11 = arith.constant 0.000000e+00 : f32
    %13 = vector.broadcast %cst_11 : f32 to vector<16x256xf32>
    %14 = arith.maximumf %12, %13 : vector<16x256xf32>
    %c0_12 = arith.constant 0 : index
    %c0_13 = arith.constant 0 : index
    %15 = vector.load %arg6[%c0_12, %c0_13] : memref<256x128xf32, #tpu.memory_space<vmem>>, vector<256x128xf32>
    %cst_14 = arith.constant dense<0.000000e+00> : vector<16x128xf32>
    %16 = tpu.matmul %14, %15, %cst_14 {dimension_numbers = #tpu.dot_dimension_numbers<[1], [0], [0], [1], [0, 0, 1, 1], [], []>} : vector<16x256xf32>, vector<256x128xf32>, vector<16x128xf32> -> vector<16x128xf32>
    %c0_15 = arith.constant 0 : index
    %c0_16 = arith.constant 0 : index
    %17 = vector.load %arg7[%c0_15, %c0_16] : memref<1x128xf32, #tpu.memory_space<vmem>>, vector<1x128xf32>
    %18 = vector.broadcast %17 : vector<1x128xf32> to vector<16x128xf32>
    %19 = arith.addf %16, %18 : vector<16x128xf32>
    %c0_17 = arith.constant 0 : index
    %c0_18 = arith.constant 0 : index
    %20 = vector.load %arg8[%c0_17, %c0_18] : memref<16x128xf32, #tpu.memory_space<vmem>>, vector<16x128xf32>
    tpu.vector_store %arg8[%c0_17, %c0_18], %19 {strides = array<i32>} : memref<16x128xf32, #tpu.memory_space<vmem>>, vector<16x128xf32>,
    return
  }
  func.func @transform_0(%arg0: i32) -> (i32, i32) {
    %c0_i32 = arith.constant 0 : i32
    %c0_i32_0 = arith.constant 0 : i32
    return %arg0, %c0_i32 : i32, i32
  }
  func.func @transform_1(%arg0: i32) -> (i32, i32) {
    %c0_i32 = arith.constant 0 : i32
    %c0_i32_0 = arith.constant 0 : i32
    %c0_i32_1 = arith.constant 0 : i32
    return %c0_i32, %c0_i32_0 : i32, i32
  }
  func.func @transform_2(%arg0: i32) -> (i32, i32) {
    %c0_i32 = arith.constant 0 : i32
    %c0_i32_0 = arith.constant 0 : i32
    %c0_i32_1 = arith.constant 0 : i32
    return %c0_i32, %c0_i32_0 : i32, i32
  }
  func.func @transform_3(%arg0: i32) -> (i32, i32) {
    %c0_i32 = arith.constant 0 : i32
    %c0_i32_0 = arith.constant 0 : i32
    %c0_i32_1 = arith.constant 0 : i32
    return %c0_i32, %c0_i32_0 : i32, i32
  }
  func.func @transform_4(%arg0: i32) -> (i32, i32) {
    %c0_i32 = arith.constant 0 : i32
    %c0_i32_0 = arith.constant 0 : i32
    %c0_i32_1 = arith.constant 0 : i32
    return %c0_i32, %c0_i32_0 : i32, i32
  }
  func.func @transform_5(%arg0: i32) -> (i32, i32) {
    %c0_i32 = arith.constant 0 : i32
    %c0_i32_0 = arith.constant 0 : i32
    %c0_i32_1 = arith.constant 0 : i32
    return %c0_i32, %c0_i32_0 : i32, i32
  }
  func.func @transform_6(%arg0: i32) -> (i32, i32) {
    %c0_i32 = arith.constant 0 : i32
    %c0_i32_0 = arith.constant 0 : i32
    %c0_i32_1 = arith.constant 0 : i32
    return %c0_i32, %c0_i32_0 : i32, i32
  }
  func.func @transform_7(%arg0: i32) -> (i32, i32) {
    %c0_i32 = arith.constant 0 : i32
    %c0_i32_0 = arith.constant 0 : i32
    return %arg0, %c0_i32 : i32, i32
  }
}

</mosaic_0001>

<bundles_post_ra>
// kernel: tpu_custom_call.1
= control target key start
LH: loop header
LB: loop body
LE: loop exit
PB: predicated region body
PF: predicated region fallthrough
CT: control target
= control target key end

     0   :  { %12 = vsyncpa [#allocation3], 0  ;;  %s1658_s0 = inlined_call_operand.hbm [shape: f32[32,128], index: 0, kind: input, shape index: {}]   ;;  %s1659_s1 = inlined_call_operand.hbm [shape: f32[128,256], index: 1, kind: input, shape index: {}]   ;;  %s1660_s2 = inlined_call_operand.vmem [shape: f32[1,256], index: 2, kind: input, shape index: {}]   ;;  %s1661_s3 = inlined_call_operand.hbm [shape: f32[256,256], index: 3, kind: input, shape index: {}]   ;;  %s1662_s4 = inlined_call_operand.vmem [shape: f32[1,256], index: 4, kind: input, shape index: {}]   ;;  %s1663_s5 = inlined_call_operand.hbm [shape: f32[256,128], index: 5, kind: input, shape index: {}]   ;;  %s1664_s6 = inlined_call_operand.vmem [shape: f32[1,128], index: 6, kind: input, shape index: {}]   ;;  %s1665_s7 = inlined_call_operand.hbm [shape: f32[32,128], index: 7, kind: output, shape index: {}]  }
   0x1   :  { %14 = vsyncpa [#allocation3 + $0x1], 0 }
   0x2   :  { %15 = vsyncpa [#allocation6], 0 }
   0x3   :  { %16 = vsyncpa [#allocation9], 0 }
   0x4   :  { %17 = vsyncpa [#allocation4], 0 }
   0x5   :  { %19 = vsyncpa [#allocation4 + $0x1], 0  ;;  %s1374_s24 = smov 0   ;;  %s1376_s25 = smov 0  }
   0x6   :  { %s1378_s26 = smov 0   ;;  %s1380_s27 = smov 0  }
   0x7 LB: > { %s1395_s28 = sadd.s32 4294967295, %s1320_s27   ;;  %s859_s29 = sadd.s32 4294967294, %s1320_s27   ;;  %s1320_s27 = sphi %s1380_s27, %s1691_s27   ;;  %s1316_s26 = sphi %s1378_s26, %s1690_s26   ;;  %s1312_s25 = sphi %s1376_s25, %s1689_s25   ;;  %s1308_s24 = sphi %s1374_s24, %s1688_s24  }
   0x8   : > { %p45_p0 = scmp.ne.s32.totalorder %s1312_s25, %s1308_s24  ;;  %p1666_p1 = scmp.eq.s32.totalorder %s1395_s28, 0 }
   0x9   : > { %p201_p3 = scmp.eq.s32.totalorder %s859_s29, 1  ;;  %p860_p5 = scmp.ge.s32.totalorder %s1320_s27, 1 }
   0xa   : > { %p1404_p4 = por %p1666_p1, %p45_p0  ;;  %p208_p7 = scmp.lt.s32.totalorder %s1320_s27, 3 }
   0xb   : > { %p1409_p6 = por %p201_p3, %p45_p0  ;;  %s1322_s10 = smov [#allocation5]  }
   0xc   : > { %s1670_s30 = scalar_select %p1404_p4, 1, 0 }
   0xd   : > { %s1671_s8 = scalar_select %p1409_p6, 1, 0 }
   0xe   : > { %p1414_p8 = pnand %p860_p5, %p208_p7  ;;  %s220_s11 = sshll.u32 %s1322_s10, 4  ;;  %s1418_s11 = int_to_ptr.vmem [resolvable:$true] %s220_s11 }
   0xf   : > { %1672 = sst [smem:[#allocation15_spill]] %s1671_s8  ;;  %s1323_s13 = smov [#allocation7]  }
  0x10   : > { %s1673_s9 = scalar_select %p1414_p8, 1, 0 }
  0x11   : > { %p1064_p9 = pneg %p1414_p8  ;;  %s236_s14 = sshll.u32 %s1323_s13, 4  ;;  %s1429_s14 = int_to_ptr.vmem [resolvable:$true] %s236_s14 }
  0x12   : > { %s1324_s15 = smov [#allocation8]   ;;  %s1132_s19 = scalar_lea.hbm %s1659_s1, 4096 }
  0x13   : > { %p1425_p11 = pnand %p1064_p9, %p1666_p1  ;;  %s1431_s16 = sshll.u32 %s1324_s15, 4  ;;  %s253_s16 = int_to_ptr.vmem [resolvable:$true] %s1431_s16 }
  0x14   : > { %p1133_p12 = scmp.ne.s32.totalorder %s1659_s1, %s1132_s19  ;;  %p1139_p5 = scmp.lt.u32.totalorder %s1132_s19, %s1659_s1 }
  0x15   : > { %p1441_p13 = pneg %p1425_p11 }
  0x17   : > { %p1135_p0 = pnand %p1441_p13, %p1133_p12 }
  0x19   : > { %p1136_p3 = pneg %p1135_p0 }
  0x1b   : > { %p1141_p7 = pnand %p1139_p5, %p1136_p3 }
  0x1d   : > { %1144 = shalt.err (!%p1141_p7)
}
  0x1e   : > { %s1145_s10 = scalar_lea.vmem %s1418_s11, 4096  ;;  %p1153_p2 = scmp.lt.s32.totalorder %s1418_s11, %s1418_s11 }
  0x1f   : > { %p1146_p9 = scmp.ne.s32.totalorder %s1418_s11, %s1145_s10  ;;  %p1154_p6 = scmp.lt.s32.totalorder %s1145_s10, %s1145_s10 }
  0x21   : > { %p1148_p10 = pnand %p1146_p9, %p1441_p13  ;;  %p1155_p12 = por %p1154_p6, %p1153_p2 }
  0x23   : > { %p1149_p1 = pneg %p1148_p10 }
  0x25   : > { %p1156_p0 = pnand %p1155_p12, %p1149_p1 }
  0x27   : > { %1159 = shalt.err (!%p1156_p0)
}
  0x28   : > { %s1325_s13 = smov 256   ;;  %s1326_s15 = smov 16  }
  0x29   : > { %1067 = dma.hbm_to_vmem [thread:$0]  (!%p1425_p11), %s1659_s1, 4096, %s1418_s11, [#allocation6], %s1325_s13, %s1325_s13, %s1326_s15  }
  0x2a   : > { %s1160_s21 = scalar_lea.hbm %s1661_s3, 8192 }
  0x2b   : > { %p1161_p2 = scmp.ne.s32.totalorder %s1661_s3, %s1160_s21  ;;  %p1167_p10 = scmp.lt.u32.totalorder %s1160_s21, %s1661_s3 }
  0x2d   : > { %p1163_p1 = pnand %p1161_p2, %p1441_p13 }
  0x2f   : > { %p1164_p6 = pneg %p1163_p1 }
  0x31   : > { %p1169_p3 = pnand %p1167_p10, %p1164_p6 }
  0x33   : > { %1172 = shalt.err (!%p1169_p3)
}
  0x34   : > { %s1173_s11 = scalar_lea.vmem %s1429_s14, 8192  ;;  %p1181_p12 = scmp.lt.s32.totalorder %s1429_s14, %s1429_s14 }
  0x35   : > { %p1174_p5 = scmp.ne.s32.totalorder %s1429_s14, %s1173_s11  ;;  %p1182_p0 = scmp.lt.s32.totalorder %s1173_s11, %s1173_s11 }
  0x37   : > { %p1176_p7 = pnand %p1174_p5, %p1441_p13  ;;  %p1183_p2 = por %p1182_p0, %p1181_p12 }
  0x39   : > { %p1177_p9 = pneg %p1176_p7 }
  0x3b   : > { %p1184_p1 = pnand %p1183_p2, %p1177_p9 }
  0x3d   : > { %1187 = shalt.err (!%p1184_p1)
}
  0x3e   : > { %1070 = dma.hbm_to_vmem [thread:$0]  (!%p1425_p11), %s1661_s3, 8192, %s1429_s14, [#allocation6], %s1325_s13, %s1325_s13, %s1326_s15  }
  0x3f   : > { %s1188_s20 = scalar_lea.hbm %s1663_s5, 4096 }
  0x40   : > { %p1189_p6 = scmp.ne.s32.totalorder %s1663_s5, %s1188_s20  ;;  %p1195_p5 = scmp.lt.u32.totalorder %s1188_s20, %s1663_s5 }
  0x42   : > { %p1191_p10 = pnand %p1189_p6, %p1441_p13 }
  0x44   : > { %p1192_p3 = pneg %p1191_p10 }
  0x46   : > { %p1197_p7 = pnand %p1195_p5, %p1192_p3 }
  0x48   : > { %1200 = shalt.err (!%p1197_p7)
}
  0x49   : > { %s1201_s11 = scalar_lea.vmem %s253_s16, 4096  ;;  %p1209_p2 = scmp.lt.s32.totalorder %s253_s16, %s253_s16 }
  0x4a   : > { %p1202_p9 = scmp.ne.s32.totalorder %s253_s16, %s1201_s11  ;;  %p1210_p1 = scmp.lt.s32.totalorder %s1201_s11, %s1201_s11 }
  0x4c   : > { %p1204_p12 = pnand %p1202_p9, %p1441_p13  ;;  %p1211_p4 = por %p1210_p1, %p1209_p2 }
  0x4e   : > { %p1205_p0 = pneg %p1204_p12 }
  0x50   : > { %p1212_p8 = pnand %p1211_p4, %p1205_p0 }
  0x52   : > { %1215 = shalt.err (!%p1212_p8)
}
  0x53   : > { %s1327_s14 = smov 128   ;;  %s1328_s22 = smov 8  }
  0x54   : > { %1073 = dma.hbm_to_vmem [thread:$0]  (!%p1425_p11), %s1663_s5, 4096, %s253_s16, [#allocation9], %s1327_s14, %s1327_s14, %s1328_s22  }
  0x55   : > { %s1508_s8 = sadd.s32 1, %s1320_s27   ;;  %s32_s18 = sadd.s32 1, %s1316_s26 }
  0x56   : > { %s29_s17 = ssub.s32 %s1320_s27, %s1508_s8  ;;  %p39_p8 = scmp.ne.s32.totalorder %s1316_s26, %s1312_s25 }
  0x57   : > { %p30_p4 = scmp.eq.s32.totalorder %s29_s17, 0  ;;  %p40_p13 = scmp.eq.s32.totalorder %s1320_s27, 0 }
  0x58   : > { %p1085_p6 = scmp.lt.s32.totalorder %s1320_s27, 2  ;;  %p1676_p3 = scmp.eq.s32.totalorder %s1395_s28, 1 }
  0x59   : > { %s1518_s19 = scalar_select %p30_p4, %s1316_s26, %s32_s18  }
  0x5a   : > { %p41_p10 = por %p40_p13, %p39_p8  ;;  %p1522_p5 = por %p1676_p3, %p39_p8 }
  0x5b   : > { %s269_s20 = sand.u32 1, %s1316_s26   ;;  %s880_s21 = sshll.u32 %s1320_s27, 8 }
  0x5c   : > { %s865_s16 = sshll.u32 %s269_s20, 4  ;;  %s1531_s10 = scalar_lea.hbm %s1658_s0, %s880_s21 }
  0x5d   : > { %s273_s11 = scalar_lea.vmem [#allocation2], %s865_s16  ;;  %p1533_p11 = pnand %p1085_p6, %p41_p10 }
  0x5e   : > { %s280_s13 = sshll.u32 %s273_s11, 4  ;;  %s1539_s17 = scalar_lea.sflag [#allocation3], %s269_s20  ;;  %s1537_s13 = int_to_ptr.vmem [resolvable:$true] %s280_s13 }
  0x5f   : > { %s1216_s18 = scalar_lea.hbm %s1531_s10, 256  ;;  %p1218_p9 = pneg %p1533_p11 }
  0x60   : > { %p1217_p7 = scmp.ne.s32.totalorder %s1531_s10, %s1216_s18  ;;  %s1221_s23 = scalar_lea.hbm %s1658_s0, 512 }
  0x61   : > { %p1222_p2 = scmp.lt.u32.totalorder %s1531_s10, %s1658_s0  ;;  %p1223_p1 = scmp.lt.u32.totalorder %s1221_s23, %s1216_s18 }
  0x62   : > { %p1219_p12 = pnand %p1218_p9, %p1217_p7  ;;  %p1225_p8 = scmp.lt.u32.totalorder %s1216_s18, %s1531_s10 }
  0x63   : > { %p1224_p4 = por %p1223_p1, %p1222_p2 }
  0x64   : > { %p1220_p0 = pneg %p1219_p12 }
  0x65   : > { %p1226_p13 = por %p1225_p8, %p1224_p4 }
  0x67   : > { %p1227_p6 = pnand %p1226_p13, %p1220_p0 }
  0x69   : > { %1230 = shalt.err (!%p1227_p6)
}
  0x6a   : > { %s1231_s20 = scalar_lea.vmem %s1537_s13, 256  ;;  %s1329_s21 = smov [#allocation2]  }
  0x6b   : > { %p1232_p10 = scmp.ne.s32.totalorder %s1537_s13, %s1231_s20  ;;  %s1236_s16 = sshll.u32 %s1329_s21, 4  ;;  %s1237_s16 = int_to_ptr.vmem [resolvable:$false] %s1236_s16 }
  0x6c   : > { %s1238_s29 = scalar_lea.vmem %s1237_s16, 512  ;;  %p1239_p12 = scmp.lt.s32.totalorder %s1537_s13, %s1237_s16 }
  0x6d   : > { %p1234_p3 = pnand %p1232_p10, %p1218_p9  ;;  %p1240_p2 = scmp.lt.s32.totalorder %s1238_s29, %s1231_s20 }
  0x6f   : > { %p1235_p7 = pneg %p1234_p3  ;;  %p1241_p1 = por %p1240_p2, %p1239_p12 }
  0x71   : > { %p1242_p4 = pnand %p1241_p1, %p1235_p7 }
  0x73   : > { %1245 = shalt.err (!%p1242_p4)
}
  0x74   : > { %1077 = dma.hbm_to_vmem [thread:$0]  (!%p1533_p11), %s1531_s10, 256, %s1537_s13, %s1539_s17, %s1327_s14, %s1327_s14, %s1328_s22  }
  0x75   : > { %p1679_p9 = scmp.ne.s32.totalorder %s1673_s9, 0 }
  0x76   : > { %s1573_s18 = sand.u32 (!%p1679_p9), 1, %s1312_s25   ;;  %p1680_p0 = scmp.ne.s32.totalorder (!%p1679_p9), %s1670_s30, 0 }
  0x77   : > { %292 = sbr.rel (%p1679_p9) target bundleno = 841 (0x349), region = 48  ;;  %s869_s23 = sshll.u32 (!%p1679_p9), %s1573_s18, 4 }
  0x78   : > { %s295_s11 = scalar_lea.sflag (!%p1679_p9), [#allocation3], %s1573_s18  ;;  %s1579_s15 = scalar_lea.vmem (!%p1679_p9), [#allocation2], %s869_s23 }
  0x7e   : > { %1291 = dma.done.wait (%p1680_p0), %s295_s11, 256  }
  0x7f   : > { %1293 = vsyncadd (%p1680_p0), %s295_s11, 4294967040  ;;  %p1681_p11 = scmp.eq.s32.totalorder %s1395_s28, 0 }
  0x81   : > { %1295 = dma.done.wait (%p1681_p11), [#allocation6], 12288   ;;  %p1682_p8 = pmov %p1681_p11 }
  0x83   : > { %1297 = vsyncadd (%p1682_p8), [#allocation6], 4294955008  ;;  %p1683_p13 = pmov %p1682_p8 }
  0x84   : > { %p1684_p6 = pmov %p1682_p8 }
  0x85   : > { %1299 = dma.done.wait (%p1683_p13), [#allocation9], 4096  }
  0x86   : > { %1301 = vsyncadd (%p1684_p6), [#allocation9], 4294963200  ;;  %v1330_v0 = vmov 0.0   ;;  %v346_v1 = vld [vmem:[#allocation5 + $0x8] sm:$0xff]  ;;  %v348_v2 = vld [vmem:[#allocation5 + $0x18] sm:$0xff]  ;;  %s340_s17 = scalar_lea.vmem [#allocation10], %s869_s23 }
  0x87   : > { %453 = vmatprep.mubr.f32.mxu0 %v1330_v0  ;;  %v345_v3 = vld [vmem:[#allocation5] sm:$0xff]  ;;  %v920_v4 = vpack.c.bf16 %v348_v2, %v346_v1  ;;  %v347_v5 = vld [vmem:[#allocation5 + $0x10] sm:$0xff]  ;;  %v350_v6 = vld [vmem:[#allocation5 + $0x28] sm:$0xff]  ;;  %s757_s20 = sshll.u32 %s340_s17, 4  ;;  %s881_s21 = sshll.u32 %s1395_s28, 8  ;;  %s1609_s20 = int_to_ptr.vmem [resolvable:$true] %s757_s20 }
  0x88   : > { %v352_v7 = vld [vmem:[#allocation5 + $0x38] sm:$0xff]  ;;  %v922_v8 = vpack.c.bf16 %v347_v5, %v345_v3  ;;  %v349_v10 = vld [vmem:[#allocation5 + $0x20] sm:$0xff]  ;;  %v351_v11 = vld [vmem:[#allocation5 + $0x30] sm:$0xff]  ;;  %s1614_s11 = scalar_lea.hbm %s1665_s7, %s881_s21  ;;  %s744_s23 = scalar_lea.sflag [#allocation4], %s1573_s18 }
  0x89   : > { %v924_v9 = vpack.c.bf16 %v352_v7, %v350_v6  ;;  %v354_v12 = vld [vmem:[#allocation5 + $0x48] sm:$0xff]  ;;  %921 = vmatprep.subr.bf16.mxu0 %v920_v4  ;;  %v356_v13 = vld [vmem:[#allocation5 + $0x58] sm:$0xff]  ;;  %v926_v14 = vpack.c.bf16 %v351_v11, %v349_v10  ;;  %v353_v16 = vld [vmem:[#allocation5 + $0x40] sm:$0xff]  ;;  %s1331_s28 = smov [#allocation10]  }
  0x8a   : > { %923 = vmatpush1.bf16.msra.mxu0 %v922_v8  ;;  %v928_v15 = vpack.c.bf16 %v356_v13, %v354_v12  ;;  %v355_v17 = vld [vmem:[#allocation5 + $0x50] sm:$0xff]  ;;  %v358_v18 = vld [vmem:[#allocation5 + $0x68] sm:$0xff]  ;;  %v360_v19 = vld [vmem:[#allocation5 + $0x78] sm:$0xff]  ;;  %s1250_s30 = sshll.u32 %s1331_s28, 4  ;;  %s1251_s30 = int_to_ptr.vmem [resolvable:$false] %s1250_s30 }
  0x8b   : > { %925 = vmatprep.subr.bf16.mxu0 %v924_v9  ;;  %v930_v20 = vpack.c.bf16 %v355_v17, %v353_v16  ;;  %v932_v21 = vpack.c.bf16 %v360_v19, %v358_v18  ;;  %v357_v22 = vld [vmem:[#allocation5 + $0x60] sm:$0xff]  ;;  %v359_v23 = vld [vmem:[#allocation5 + $0x70] sm:$0xff]  ;;  %v362_v24 = vld [vmem:[#allocation5 + $0x88] sm:$0xff]  ;;  %s1252_s9 = scalar_lea.vmem %s1251_s30, 512  ;;  %p1253_p12 = scmp.lt.s32.totalorder %s1609_s20, %s1251_s30 }
  0x8c   : > { %v364_v25 = vld [vmem:[#allocation5 + $0x98] sm:$0xff]  ;;  %v361_v26 = vld [vmem:[#allocation5 + $0x80] sm:$0xff]  ;;  %v363_v27 = vld [vmem:[#allocation5 + $0x90] sm:$0xff]  ;;  %v934_v30 = vpack.c.bf16 %v359_v23, %v357_v22 }
  0x8d   : > { %v471_v28 = vld [vmem:[#allocation7 + $0x8] sm:$0xff]  ;;  %v473_v29 = vld [vmem:[#allocation7 + $0x18] sm:$0xff]  ;;  %v470_v33 = vld [vmem:[#allocation7] sm:$0xff]  ;;  %v936_v36 = vpack.c.bf16 %v364_v25, %v362_v24  ;;  %v938_v46 = vpack.c.bf16 %v363_v27, %v361_v26 }
  0x8e   : > { %927 = vmatpush1.bf16.msra.mxu0 %v926_v14  ;;  %v366_v31 = vld [vmem:[#allocation5 + $0xa8] sm:$0xff]  ;;  %v952_v32 = vpack.c.bf16 %v473_v29, %v471_v28  ;;  %v472_v34 = vld [vmem:[#allocation7 + $0x10] sm:$0xff]  ;;  %v477_v38 = vld [vmem:[#allocation7 + $0x38] sm:$0xff] }
  0x8f   : > { %929 = vmatprep.subr.bf16.mxu0 %v928_v15  ;;  %v475_v35 = vld [vmem:[#allocation7 + $0x28] sm:$0xff]  ;;  %v954_v37 = vpack.c.bf16 %v472_v34, %v470_v33  ;;  %v474_v39 = vld [vmem:[#allocation7 + $0x20] sm:$0xff]  ;;  %v476_v40 = vld [vmem:[#allocation7 + $0x30] sm:$0xff] }
  0x90   : > { %v368_v41 = vld [vmem:[#allocation5 + $0xb8] sm:$0xff]  ;;  %953 = vmatprep.subr.bf16.mxu1 %v952_v32  ;;  %v956_v42 = vpack.c.bf16 %v477_v38, %v475_v35  ;;  %v479_v43 = vld [vmem:[#allocation7 + $0x48] sm:$0xff]  ;;  %v958_v45 = vpack.c.bf16 %v476_v40, %v474_v39  ;;  %v365_v47 = vld [vmem:[#allocation5 + $0xa0] sm:$0xff] }
  0x91   : > { %v481_v44 = vld [vmem:[#allocation7 + $0x58] sm:$0xff]  ;;  %955 = vmatpush1.bf16.msra.mxu1 %v954_v37  ;;  %v478_v49 = vld [vmem:[#allocation7 + $0x40] sm:$0xff]  ;;  %v480_v50 = vld [vmem:[#allocation7 + $0x50] sm:$0xff]  ;;  %v940_v51 = vpack.c.bf16 %v368_v41, %v366_v31 }
  0x92   : > { %931 = vmatpush1.bf16.msra.mxu0 %v930_v20  ;;  %957 = vmatprep.subr.bf16.mxu1 %v956_v42  ;;  %v960_v48 = vpack.c.bf16 %v481_v44, %v479_v43  ;;  %v367_v52 = vld [vmem:[#allocation5 + $0xb0] sm:$0xff]  ;;  %v483_v53 = vld [vmem:[#allocation7 + $0x68] sm:$0xff]  ;;  %v485_v54 = vld [vmem:[#allocation7 + $0x78] sm:$0xff]  ;;  %v962_v57 = vpack.c.bf16 %v480_v50, %v478_v49 }
  0x93   : > { %933 = vmatprep.subr.bf16.mxu0 %v932_v21  ;;  %v370_v55 = vld [vmem:[#allocation5 + $0xc8] sm:$0xff]  ;;  %v372_v56 = vld [vmem:[#allocation5 + $0xd8] sm:$0xff]  ;;  %v942_v58 = vpack.c.bf16 %v367_v52, %v365_v47  ;;  %v369_v59 = vld [vmem:[#allocation5 + $0xc0] sm:$0xff]  ;;  %v964_v60 = vpack.c.bf16 %v485_v54, %v483_v53 }
  0x94   : > { %v482_v61 = vld [vmem:[#allocation7 + $0x60] sm:$0xff]  ;;  %v484_v62 = vld [vmem:[#allocation7 + $0x70] sm:$0xff]  ;;  %v944_v63 = vpack.c.bf16 %v372_v56, %v370_v55  ;;  %v487_v2 = vld [vmem:[#allocation7 + $0x88] sm:$0xff] }
  0x95   : > { %959 = vmatpush1.bf16.msra.mxu1 %v958_v45  ;;  %v371_v1 = vld [vmem:[#allocation5 + $0xd0] sm:$0xff]  ;;  %v489_v3 = vld [vmem:[#allocation7 + $0x98] sm:$0xff]  ;;  %v374_v4 = vld [vmem:[#allocation5 + $0xe8] sm:$0xff]  ;;  %v966_v6 = vpack.c.bf16 %v484_v62, %v482_v61 }
  0x96   : > { %935 = vmatpush1.bf16.msra.mxu0 %v934_v30  ;;  %961 = vmatprep.subr.bf16.mxu1 %v960_v48  ;;  %v376_v5 = vld [vmem:[#allocation5 + $0xf8] sm:$0xff]  ;;  %v946_v7 = vpack.c.bf16 %v371_v1, %v369_v59  ;;  %v373_v8 = vld [vmem:[#allocation5 + $0xe0] sm:$0xff]  ;;  %v968_v9 = vpack.c.bf16 %v489_v3, %v487_v2  ;;  %v488_v11 = vld [vmem:[#allocation7 + $0x90] sm:$0xff] }
  0x97   : > { %937 = vmatprep.subr.bf16.mxu0 %v936_v36  ;;  %v486_v10 = vld [vmem:[#allocation7 + $0x80] sm:$0xff]  ;;  %v948_v12 = vpack.c.bf16 %v376_v5, %v374_v4  ;;  %v375_v13 = vld [vmem:[#allocation5 + $0xf0] sm:$0xff]  ;;  %v491_v14 = vld [vmem:[#allocation7 + $0xa8] sm:$0xff] }
  0x98   : > { %v493_v15 = vld [vmem:[#allocation7 + $0xb8] sm:$0xff]  ;;  %v970_v16 = vpack.c.bf16 %v488_v11, %v486_v10  ;;  %v950_v17 = vpack.c.bf16 %v375_v13, %v373_v8  ;;  %v490_v19 = vld [vmem:[#allocation7 + $0xa0] sm:$0xff]  ;;  %v492_v20 = vld [vmem:[#allocation7 + $0xb0] sm:$0xff] }
  0x99   : > { %963 = vmatpush1.bf16.msra.mxu1 %v962_v57  ;;  %v972_v18 = vpack.c.bf16 %v493_v15, %v491_v14  ;;  %v495_v21 = vld [vmem:[#allocation7 + $0xc8] sm:$0xff]  ;;  %v497_v22 = vld [vmem:[#allocation7 + $0xd8] sm:$0xff]  ;;  %v974_v23 = vpack.c.bf16 %v492_v20, %v490_v19  ;;  %v343_v24 = vld [vmem:[%s1579_s15] sm:$0xff] }
  0x9a   : > { %939 = vmatpush1.bf16.msra.mxu0 %v938_v46  ;;  %965 = vmatprep.subr.bf16.mxu1 %v964_v60  ;;  %v976_v25 = vpack.c.bf16 %v497_v22, %v495_v21  ;;  %v494_v26 = vld [vmem:[#allocation7 + $0xc0] sm:$0xff]  ;;  %v496_v27 = vld [vmem:[#allocation7 + $0xd0] sm:$0xff]  ;;  %v499_v28 = vld [vmem:[#allocation7 + $0xe8] sm:$0xff] }
  0x9b   : > { %941 = vmatprep.subr.bf16.mxu0 %v940_v51  ;;  %v501_v29 = vld [vmem:[#allocation7 + $0xf8] sm:$0xff]  ;;  %v978_v30 = vpack.c.bf16 %v496_v27, %v494_v26  ;;  %v498_v33 = vld [vmem:[#allocation7 + $0xe0] sm:$0xff]  ;;  %v500_v34 = vld [vmem:[#allocation7 + $0xf0] sm:$0xff] }
  0x9c   : > { %v344_v31 = vld [vmem:[%s1579_s15 + $0x8] sm:$0xff]  ;;  %v980_v32 = vpack.c.bf16 %v501_v29, %v499_v28  ;;  %v982_v37 = vpack.c.bf16 %v500_v34, %v498_v33  ;;  %v502_v39 = vld [vmem:[#allocation7 + $0x100] sm:$0xff]  ;;  %v504_v40 = vld [vmem:[#allocation7 + $0x110] sm:$0xff]  ;;  %s1246_s15 = scalar_lea.vmem %s1609_s20, 256 }
  0x9d   : > { %967 = vmatpush1.bf16.msra.mxu1 %v966_v6  ;;  %v503_v35 = vld [vmem:[#allocation7 + $0x108] sm:$0xff]  ;;  %v505_v36 = vld [vmem:[#allocation7 + $0x118] sm:$0xff]  ;;  %v986_v43 = vpack.c.bf16 %v504_v40, %v502_v39  ;;  %v506_v44 = vld [vmem:[#allocation7 + $0x120] sm:$0xff]  ;;  %p1247_p10 = scmp.ne.s32.totalorder %s1609_s20, %s1246_s15  ;;  %p1254_p2 = scmp.lt.s32.totalorder %s1252_s9, %s1246_s15 }
  0x9e   : > { %943 = vmatpush1.bf16.msra.mxu0 %v942_v58  ;;  %969 = vmatprep.subr.bf16.mxu1 %v968_v9  ;;  %v984_v38 = vpack.c.bf16 %v505_v36, %v503_v35  ;;  %v507_v41 = vld [vmem:[#allocation7 + $0x128] sm:$0xff]  ;;  %v509_v42 = vld [vmem:[#allocation7 + $0x138] sm:$0xff]  ;;  %v508_v45 = vld [vmem:[#allocation7 + $0x130] sm:$0xff] }
  0x9f   : > { %945 = vmatprep.subr.bf16.mxu0 %v944_v63  ;;  %v511_v46 = vld [vmem:[#allocation7 + $0x148] sm:$0xff]  ;;  %v513_v47 = vld [vmem:[#allocation7 + $0x158] sm:$0xff]  ;;  %v990_v48 = vpack.c.bf16 %v508_v45, %v506_v44  ;;  %v510_v50 = vld [vmem:[#allocation7 + $0x140] sm:$0xff]  ;;  %p1248_p3 = pnand %p1247_p10, %p1522_p5  ;;  %p1255_p1 = por %p1254_p2, %p1253_p12 }
  0xa0   : > { %v992_v49 = vpack.c.bf16 %v513_v47, %v511_v46  ;;  %v512_v51 = vld [vmem:[#allocation7 + $0x150] sm:$0xff]  ;;  %v515_v52 = vld [vmem:[#allocation7 + $0x168] sm:$0xff]  ;;  %v517_v53 = vld [vmem:[#allocation7 + $0x178] sm:$0xff] }
  0xa1   : > { %971 = vmatpush1.bf16.msra.mxu1 %v970_v16  ;;  %v994_v54 = vpack.c.bf16 %v512_v51, %v510_v50  ;;  %v996_v55 = vpack.c.bf16 %v517_v53, %v515_v52  ;;  %v514_v56 = vld [vmem:[#allocation7 + $0x160] sm:$0xff]  ;;  %v516_v57 = vld [vmem:[#allocation7 + $0x170] sm:$0xff]  ;;  %v519_v58 = vld [vmem:[#allocation7 + $0x188] sm:$0xff]  ;;  %p1249_p7 = pneg %p1248_p3 }
  0xa2   : > { %947 = vmatpush1.bf16.msra.mxu0 %v946_v7  ;;  %973 = vmatprep.subr.bf16.mxu1 %v972_v18  ;;  %v521_v59 = vld [vmem:[#allocation7 + $0x198] sm:$0xff]  ;;  %v998_v60 = vpack.c.bf16 %v516_v57, %v514_v56  ;;  %v518_v62 = vld [vmem:[#allocation7 + $0x180] sm:$0xff]  ;;  %v520_v63 = vld [vmem:[#allocation7 + $0x190] sm:$0xff] }
  0xa3   : > { %949 = vmatprep.subr.bf16.mxu0 %v948_v12  ;;  %v1000_v61 = vpack.c.bf16 %v521_v59, %v519_v58  ;;  %v523_v1 = vld [vmem:[#allocation7 + $0x1a8] sm:$0xff]  ;;  %v525_v2 = vld [vmem:[#allocation7 + $0x1b8] sm:$0xff]  ;;  %v1002_v3 = vpack.c.bf16 %v520_v63, %v518_v62  ;;  %v522_v5 = vld [vmem:[#allocation7 + $0x1a0] sm:$0xff]  ;;  %v379_v58 = vlaneseq  ;;  %p1256_p4 = pnand %p1255_p1, %p1249_p7 }
  0xa4   : > { %v1004_v4 = vpack.c.bf16 %v525_v2, %v523_v1  ;;  %v524_v6 = vld [vmem:[#allocation7 + $0x1b0] sm:$0xff]  ;;  %v527_v7 = vld [vmem:[#allocation7 + $0x1c8] sm:$0xff]  ;;  %v529_v8 = vld [vmem:[#allocation7 + $0x1d8] sm:$0xff] }
  0xa5   : > { %975 = vmatpush1.bf16.msra.mxu1 %v974_v23  ;;  %v1006_v9 = vpack.c.bf16 %v524_v6, %v522_v5  ;;  %v1008_v10 = vpack.c.bf16 %v529_v8, %v527_v7  ;;  %v526_v11 = vld [vmem:[#allocation7 + $0x1c0] sm:$0xff]  ;;  %v528_v12 = vld [vmem:[#allocation7 + $0x1d0] sm:$0xff]  ;;  %v531_v14 = vld [vmem:[#allocation7 + $0x1e8] sm:$0xff]  ;;  %v380_v59 = vshrl.u32 %v379_v58, 7 }
  0xa6   : > { %951 = vmatpush1.bf16.msra.mxu0 %v950_v17  ;;  %977 = vmatprep.subr.bf16.mxu1 %v976_v25  ;;  %v1010_v13 = vpack.c.bf16 %v528_v12, %v526_v11  ;;  %v533_v15 = vld [vmem:[#allocation7 + $0x1f8] sm:$0xff]  ;;  %v530_v17 = vld [vmem:[#allocation7 + $0x1e0] sm:$0xff]  ;;  %v532_v18 = vld [vmem:[#allocation7 + $0x1f0] sm:$0xff] }
  0xa7   : > { %v1012_v16 = vpack.c.bf16 %v533_v15, %v531_v14  ;;  %v1014_v19 = vpack.c.bf16 %v532_v18, %v530_v17  ;;  %v643_v20 = vld [vmem:[#allocation8 + $0x80] sm:$0xff]  ;;  %v644_v21 = vld [vmem:[#allocation8 + $0x88] sm:$0xff]  ;;  %v645_v25 = vld [vmem:[#allocation8 + $0x90] sm:$0xff]  ;;  %v385_v62 = vsub.s32 1, %v380_v59 }
  0xa8   : > { %v627_v22 = vld [vmem:[#allocation8] sm:$0xff]  ;;  %v1016_v23 = vpack.c.bf16 %v644_v21, %v643_v20  ;;  %v646_v26 = vld [vmem:[#allocation8 + $0x98] sm:$0xff]  ;;  %v629_v29 = vld [vmem:[#allocation8 + $0x10] sm:$0xff] }
  0xa9   : > { %454 = vmatmul.mubr.f32.vlgmr.msra.gmra.mrb[0].mxu0 %v343_v24  ;;  %979 = vmatpush1.bf16.msra.mxu1 %v978_v30  ;;  %v628_v24 = vld [vmem:[#allocation8 + $0x8] sm:$0xff]  ;;  %v1020_v28 = vpack.c.bf16 %v646_v26, %v645_v25  ;;  %v630_v30 = vld [vmem:[#allocation8 + $0x18] sm:$0xff]  ;;  %v631_v35 = vld [vmem:[#allocation8 + $0x20] sm:$0xff] }
  0xaa   : > { %459 = vmatprep.mubr.f32.mxu0 %v1330_v0  ;;  %981 = vmatprep.subr.bf16.mxu1 %v980_v32  ;;  %v988_v0 = vpack.c.bf16 %v509_v42, %v507_v41  ;;  %v1018_v27 = vpack.c.bf16 %v628_v24, %v627_v22  ;;  %v648_v32 = vld [vmem:[#allocation8 + $0xa8] sm:$0xff]  ;;  %v1022_v33 = vpack.c.bf16 %v630_v30, %v629_v29  ;;  %v633_v41 = vld [vmem:[#allocation8 + $0x30] sm:$0xff]  ;;  %v634_v42 = vld [vmem:[#allocation8 + $0x38] sm:$0xff] }
  0xab   : > { %1017 = vmatprep.subr.bf16.mxu0 %v1016_v23  ;;  %v632_v36 = vld [vmem:[#allocation8 + $0x28] sm:$0xff]  ;;  %v1030_v44 = vpack.c.bf16 %v634_v42, %v633_v41  ;;  %v635_v46 = vld [vmem:[#allocation8 + $0x40] sm:$0xff]  ;;  %v637_v52 = vld [vmem:[#allocation8 + $0x50] sm:$0xff] }
  0xac   : > { %1019 = vmatpush3.bf16.msra.mxu0 %v1018_v27  ;;  %v1026_v39 = vpack.c.bf16 %v632_v36, %v631_v35  ;;  %v636_v47 = vld [vmem:[#allocation8 + $0x48] sm:$0xff]  ;;  %v638_v53 = vld [vmem:[#allocation8 + $0x58] sm:$0xff]  ;;  %v639_v14 = vld [vmem:[#allocation8 + $0x60] sm:$0xff] }
  0xad   : > { %460 = vmatmul.mubr.f32.gmra.mrb[2].mxu0 %v344_v31  ;;  %983 = vmatpush1.bf16.msra.mxu1 %v982_v37  ;;  %v647_v31 = vld [vmem:[#allocation8 + $0xa0] sm:$0xff]  ;;  %v649_v37 = vld [vmem:[#allocation8 + $0xb0] sm:$0xff]  ;;  %v1034_v50 = vpack.c.bf16 %v636_v47, %v635_v46  ;;  %v1038_v56 = vpack.c.bf16 %v638_v53, %v637_v52  ;;  %v640_v15 = vld [vmem:[#allocation8 + $0x68] sm:$0xff] }
  0xae   : > { %985 = vmatprep.subr.bf16.mxu1 %v984_v38  ;;  %1021 = vmatprep.subr.bf16.mxu0 %v1020_v28  ;;  %v1024_v34 = vpack.c.bf16 %v648_v32, %v647_v31  ;;  %v650_v38 = vld [vmem:[#allocation8 + $0xb8] sm:$0xff]  ;;  %v657_v17 = vld [vmem:[#allocation8 + $0xf0] sm:$0xff]  ;;  %v534_v23 = vld [vmem:[%s1662_s4] sm:$0x3] }
  0xaf   : > { %v1028_v40 = vpack.c.bf16 %v650_v38, %v649_v37  ;;  %v658_v18 = vld [vmem:[#allocation8 + $0xf8] sm:$0xff]  ;;  %v641_v20 = vld [vmem:[#allocation8 + $0x70] sm:$0xff]  ;;  %v543_v25 = vrot.slane %v534_v23, %v385_v62 }
  0xb0   : > { %1023 = vmatpush3.bf16.msra.mxu0 %v1022_v33  ;;  %v642_v21 = vld [vmem:[#allocation8 + $0x78] sm:$0xff] }
  0xb1   : > { %987 = vmatpush1.bf16.msra.mxu1 %v986_v43  ;;  %1025 = vmatprep.subr.bf16.mxu0 %v1024_v34  ;;  %v651_v43 = vld [vmem:[#allocation8 + $0xc0] sm:$0xff]  ;;  %v1046_v22 = vpack.c.bf16 %v642_v21, %v641_v20 }
  0xb2   : > { %989 = vmatprep.subr.bf16.mxu1 %v988_v0  ;;  %v652_v0 = vld [vmem:[#allocation8 + $0xc8] sm:$0xff] }
  0xb3   : > { %v1032_v45 = vpack.c.bf16 %v652_v0, %v651_v43 }
  0xb4   : > { %1027 = vmatpush3.bf16.msra.mxu0 %v1026_v39  ;;  %v874_v39 = vld [vmem:[%s1664_s6] ss:$0 sm:$0xff] }
  0xb5   : > { %991 = vmatpush1.bf16.msra.mxu1 %v990_v48  ;;  %1029 = vmatprep.subr.bf16.mxu0 %v1028_v40  ;;  %v653_v48 = vld [vmem:[#allocation8 + $0xd0] sm:$0xff] }
  0xb6   : > { %993 = vmatprep.subr.bf16.mxu1 %v992_v49  ;;  %v654_v49 = vld [vmem:[#allocation8 + $0xd8] sm:$0xff] }
  0xb7   : > { %v1036_v51 = vpack.c.bf16 %v654_v49, %v653_v48 }
  0xb8   : > { %1031 = vmatpush3.bf16.msra.mxu0 %v1030_v44 }
  0xb9   : > { %995 = vmatpush1.bf16.msra.mxu1 %v994_v54  ;;  %1033 = vmatprep.subr.bf16.mxu0 %v1032_v45  ;;  %v655_v54 = vld [vmem:[#allocation8 + $0xe0] sm:$0xff] }
  0xba   : > { %997 = vmatprep.subr.bf16.mxu1 %v996_v55  ;;  %v656_v55 = vld [vmem:[#allocation8 + $0xe8] sm:$0xff] }
  0xbb   : > { %v1040_v57 = vpack.c.bf16 %v656_v55, %v655_v54 }
  0xbc   : > { %1035 = vmatpush3.bf16.msra.mxu0 %v1034_v50 }
  0xbd   : > { %999 = vmatpush1.bf16.msra.mxu1 %v998_v60  ;;  %1037 = vmatprep.subr.bf16.mxu0 %v1036_v51  ;;  %v381_v60 = vsub.s32 0, %v380_v59 }
  0xbe   : > { %1001 = vmatprep.subr.bf16.mxu1 %v1000_v61  ;;  %v377_v61 = vld [vmem:[%s1660_s2] sm:$0x3] }
  0xbf   : > { %v382_v63 = vrot.slane %v377_v61, %v381_v60  ;;  %v386_v1 = vrot.slane %v377_v61, %v385_v62  ;;  %v539_v24 = vrot.slane %v534_v23, %v381_v60 }
  0xc0   : > { %1039 = vmatpush3.bf16.msra.mxu0 %v1038_v56 }
  0xc1   : > { %1003 = vmatpush1.bf16.msra.mxu1 %v1002_v3  ;;  %1041 = vmatprep.subr.bf16.mxu0 %v1040_v57 }
  0xc2   : > { %1005 = vmatprep.subr.bf16.mxu1 %v1004_v4 }
  0xc5   : > { %1007 = vmatpush1.bf16.msra.mxu1 %v1006_v9 }
  0xc6   : > { %1009 = vmatprep.subr.bf16.mxu1 %v1008_v10 }
  0xc9   : > { %1011 = vmatpush1.bf16.msra.mxu1 %v1010_v13 }
  0xca   : > { %1013 = vmatprep.subr.bf16.mxu1 %v1012_v16  ;;  %v1042_v16 = vpack.c.bf16 %v640_v15, %v639_v14 }
  0xcc   : > { %1043 = vmatpush3.bf16.msra.mxu0 %v1042_v16 }
  0xcd   : > { %1015 = vmatpush1.bf16.msra.mxu1 %v1014_v19  ;;  %v1044_v19 = vpack.c.bf16 %v658_v18, %v657_v17 }
  0xcf   : > { %1045 = vmatprep.subr.bf16.mxu0 %v1044_v19 }
  0xd0   : > { %1047 = vmatpush3.bf16.msra.mxu0 %v1046_v22 }
 0x17c   : > { %v455_v2 = vpop.f32.mrb[0].mxu0 }
 0x17d   : > { %v456_v3 = vadd.f32 %v455_v2, %v382_v63  ;;  %v457_v4 = vpop.f32.mrb[1].mxu0 }
 0x17e   : > { %v458_v5 = vadd.f32 %v457_v4, %v386_v1 }
 0x17f   : > { %v466_v8 = vmax.f32 %v456_v3, 0.0 }
 0x180   : > { %v461_v6 = vpop.f32.mrb[2].mxu0  ;;  %v467_v7 = vmax.f32 %v458_v5, 0.0 }
 0x181   : > { %v462_v9 = vadd.f32 %v461_v6, %v382_v63  ;;  %v463_v10 = vpop.f32.mrb[3].mxu0 }
 0x182   : > { %v464_v11 = vadd.f32 %v463_v10, %v386_v1  ;;  %610 = vmatprep.mubr.f32.mxu1 %v467_v7 }
 0x183   : > { %611 = vmatmul.mubr.f32.vlgmr.msra.gmra.mrb[0].mxu1 %v466_v8  ;;  %v468_v13 = vmax.f32 %v462_v9, 0.0 }
 0x184   : > { %v469_v12 = vmax.f32 %v464_v11, 0.0 }
 0x186   : > { %616 = vmatprep.mubr.f32.mxu1 %v469_v12 }
 0x187   : > { %617 = vmatmul.mubr.f32.gmra.mrb[2].mxu1 %v468_v13 }
 0x256   : > { %v612_v26 = vpop.f32.mrb[0].mxu1 }
 0x257   : > { %v613_v27 = vadd.f32 %v612_v26, %v539_v24  ;;  %v614_v28 = vpop.f32.mrb[1].mxu1 }
 0x258   : > { %v615_v29 = vadd.f32 %v614_v28, %v543_v25 }
 0x259   : > { %v623_v32 = vmax.f32 %v613_v27, 0.0 }
 0x25a   : > { %v624_v30 = vmax.f32 %v615_v29, 0.0  ;;  %v618_v31 = vpop.f32.mrb[2].mxu1 }
 0x25b   : > { %v619_v33 = vadd.f32 %v618_v31, %v539_v24  ;;  %v620_v34 = vpop.f32.mrb[3].mxu1 }
 0x25c   : > { %v621_v35 = vadd.f32 %v620_v34, %v543_v25  ;;  %730 = vmatprep.mubr.f32.mxu0 %v624_v30 }
 0x25d   : > { %731 = vmatmul.mubr.f32.vlgmr.msra.gmra.mrb[4].mxu0 %v623_v32  ;;  %v625_v37 = vmax.f32 %v619_v33, 0.0 }
 0x25e   : > { %v626_v36 = vmax.f32 %v621_v35, 0.0 }
 0x260   : > { %735 = vmatprep.mubr.f32.mxu0 %v626_v36 }
 0x261   : > { %736 = vmatmul.mubr.f32.gmra.mrb[6].mxu0 %v625_v37 }
 0x330   : > { %v914_v38 = vpop.f32.mrb[4].mxu0 }
 0x331   : > { %v915_v40 = vpop.f32.mrb[5].mxu0 }
 0x332   : > { %v916_v41 = vadd.f32 %v915_v40, %v914_v38 }
 0x334   : > { %v733_v42 = vadd.f32 %v916_v41, %v874_v39  ;;  %v917_v43 = vpop.f32.mrb[6].mxu0 }
 0x335   : > { %v918_v0 = vpop.f32.mrb[7].mxu0 }
 0x336   : > { %741 = vst [vmem:[%s340_s17] sm:$0xff] %v733_v42  ;;  %v919_v44 = vadd.f32 %v918_v0, %v917_v43 }
 0x338   : > { %v738_v45 = vadd.f32 %v919_v44, %v874_v39 }
 0x33a   : > { %742 = vst [vmem:[%s340_s17 + $0x8] sm:$0xff] %v738_v45 }
 0x33b   : > { %1259 = shalt.err (!%p1256_p4)
}
 0x33c   : > { %s1260_s14 = scalar_lea.hbm %s1614_s11, 256  ;;  %s1264_s13 = scalar_lea.hbm %s1665_s7, 512 }
 0x33d   : > { %p1261_p9 = scmp.ne.s32.totalorder %s1614_s11, %s1260_s14  ;;  %p1265_p8 = scmp.lt.u32.totalorder %s1614_s11, %s1665_s7 }
 0x33e   : > { %p1266_p13 = scmp.lt.u32.totalorder %s1264_s13, %s1260_s14  ;;  %p1268_p10 = scmp.lt.u32.totalorder %s1260_s14, %s1614_s11 }
 0x33f   : > { %p1262_p0 = pnand %p1261_p9, %p1522_p5 }
 0x340   : > { %p1267_p6 = por %p1266_p13, %p1265_p8 }
 0x341   : > { %p1263_p11 = pneg %p1262_p0 }
 0x342   : > { %p1269_p3 = por %p1268_p10, %p1267_p6 }
 0x344   : > { %p1270_p7 = pnand %p1269_p3, %p1263_p11 }
 0x346   : > { %1273 = shalt.err (!%p1270_p7)
}
 0x347   : > { %s1332_s16 = smov 128   ;;  %s1333_s29 = smov 8  }
 0x348   : > { %1062 = dma.vmem_to_hbm [thread:$0]  (%p1522_p5), %s1609_s20, 256, %s1614_s11, %s744_s23, %s1332_s16, %s1332_s16, %s1333_s29  }
 0x349 PF: > { %s1685_s15 = sld [smem:[#allocation15_spill]]  ;;  %s772_s28 = sand.u32 1, %s1308_s24  }
 0x34a   : > { %p1687_p2 = scmp.ge.s32.totalorder %s1320_s27, 2  ;;  %s773_s30 = scalar_lea.sflag [#allocation4], %s772_s28 }
 0x34f   : > { %p1686_p12 = scmp.ne.s32.totalorder %s1685_s15, 0 }
 0x351   : > { %p1079_p1 = pnand %p1687_p2, %p1686_p12 }
 0x353   : > { %1303 = dma.done.wait (!%p1079_p1), %s773_s30, 256  }
 0x354   : > { %1305 = vsyncadd (!%p1079_p1), %s773_s30, 4294967040  ;;  %p22_p4 = scmp.ge.s32.totalorder %s1508_s8, 4   ;;  %s1688_s24 = smov %s1312_s25 }
 0x355   : > { %s1689_s25 = smov %s1316_s26  ;;  %s1690_s26 = smov %s1518_s19 }
 0x356   : > { %s1691_s27 = smov %s1508_s8  ;;  %24 = sbr.rel (!%p22_p4) target bundleno = 7 (0x7), region = 105 }
 0x35d   :  { %778 = vsyncpa [#allocation3], 1 }
 0x35e   :  { %780 = vsyncpa [#allocation3 + $0x1], 1 }
 0x35f   :  { %781 = vsyncpa [#allocation6], 1 }
 0x360   :  { %782 = vsyncpa [#allocation9], 1 }
 0x361   :  { %783 = vsyncpa [#allocation4], 1 }
 0x362   :  { %785 = vsyncpa [#allocation4 + $0x1], 1 }

</bundles_post_ra>
